<compile_context>
chip_gen: v7x
topology: tpu7x:2x2x1
jax: 0.10.0
libtpu: 0.0.40
codegen_flags: <defaults>
</compile_context>

<pallas_src>
import math

import jax
import jax.numpy as jnp
from jax import lax
from jax.experimental import pallas as pl
from jax.experimental.pallas import tpu as pltpu


def _round_up(v: int, m: int) -> int:
    return ((v + m - 1) // m) * m


def _vmem_capacity_bytes() -> int:
    try:
        return int(pltpu.get_tpu_info().vmem_capacity_bytes)
    except Exception:
        return 64 * 1024 * 1024  # conservative fallback: valid on every generation


def prepare_lora_weights(lora_A: jax.Array, lora_B: jax.Array, alpha: float, rank: int,
                         compute_dtype=jnp.bfloat16):
    """One-time weight prep (cacheable by the caller).

    Folds alpha/rank into lora_A in f32 (so no per-tile scale in the kernel),
    pre-transposes lora_B, pads rank to a sublane-dense multiple of 16, and
    casts to the compute dtype.  Zero-padding the rank dim is mathematically
    a no-op for the result.
    """
    scaling = float(alpha) / float(rank)
    rank_p = max(_round_up(rank, 16), 16)
    a = (lora_A.astype(jnp.float32) * scaling).astype(compute_dtype)   # (rank, in)
    bt = lora_B.T.astype(compute_dtype)                                # (rank, out)
    if rank_p != rank:
        a = jnp.pad(a, ((0, rank_p - rank), (0, 0)))
        bt = jnp.pad(bt, ((0, rank_p - rank), (0, 0)))
    return a, bt


def _lora_kernel(x_ref, a_ref, bt_ref, o_ref, tmp_ref):
    # x_ref  : (tm, in_features)     input's native dtype (cast in-kernel)
    # a_ref  : (rank_p, in_features) compute dtype, alpha/rank already folded in
    # bt_ref : (rank_p, tn)          compute dtype, lora_B^T tile
    # o_ref  : (tm, tn)              out dtype
    # tmp_ref: (tm, rank_p)          VMEM scratch, compute dtype

    @pl.when(pl.program_id(1) == 0)
    def _():
        # tmp = x @ (scaling * A)^T, expressed as a last-dim contraction so no
        # transpose of the weight tile is materialized.  Computed once per M
        # tile and reused across all N tiles.
        x = x_ref[...].astype(a_ref.dtype)
        tmp = lax.dot_general(
            x, a_ref[...],
            dimension_numbers=(((1,), (1,)), ((), ())),
            preferred_element_type=jnp.float32,
        )  # (tm, rank_p) f32
        tmp_ref[...] = tmp.astype(tmp_ref.dtype)

    out = jnp.dot(tmp_ref[...], bt_ref[...], preferred_element_type=jnp.float32)
    # TODO(synk): nn.Dropout is identity in eval mode; training-mode dropout
    # (pltpu.prng_seed / prng_random_bits) is intentionally not applied here.
    o_ref[...] = out.astype(o_ref.dtype)


def lora_forward(x: jax.Array, lora_A: jax.Array, lora_B: jax.Array,
                 alpha: float, rank: int, *, enabled: bool = True,
                 compute_dtype=jnp.bfloat16, out_dtype=None,
                 block_m: int = 1024) -> jax.Array:
    """x: (..., in_features) -> (..., out_features), matching LoRALayer.forward."""
    in_features = lora_A.shape[1]
    out_features = lora_B.shape[0]
    lead = x.shape[:-1]

    if out_dtype is None:
        # torch.zeros_like(x @ A.T @ B.T) / the matmul result carry the promoted dtype.
        out_dtype = jnp.result_type(x.dtype, lora_A.dtype, lora_B.dtype)

    if not enabled:
        # disable_adaptation(): zeros of the output shape in the promoted dtype.
        return jnp.zeros((*lead, out_features), dtype=out_dtype)

    M = math.prod(lead) if lead else 1
    x2d = x.reshape(M, in_features)                    # no pad, no cast: saves an HBM pass

    a, bt = prepare_lora_weights(lora_A, lora_B, alpha, rank, compute_dtype)
    rank_p = a.shape[0]

    xb = jnp.dtype(x.dtype).itemsize
    ob = jnp.dtype(out_dtype).itemsize
    cb = jnp.dtype(compute_dtype).itemsize

    # N tiling only for very wide projections: bounds the double-buffered out
    # tile and the f32 result slab so tm can stay large within VMEM.
    tn = out_features if out_features <= 4096 else 2048
    grid_n = pl.cdiv(out_features, tn)

    # Generation-aware VMEM budget (64 MiB/TC on v7x, 128 MiB on v5e/v6e), with
    # headroom for Mosaic internal scratch.
    vmem_cap = _vmem_capacity_bytes() - 12 * 1024 * 1024

    def vmem_need(tm_):
        return (2 * tm_ * in_features * xb        # double-buffered x tiles (native dtype)
                + 2 * tm_ * tn * ob               # double-buffered out tiles
                + 2 * rank_p * in_features * cb   # resident lora_A
                + 2 * rank_p * tn * cb            # lora_B^T tile
                + tm_ * rank_p * cb               # tmp scratch
                + tm_ * in_features * cb          # in-kernel bf16 copy of the x tile
                + tm_ * rank_p * 4                # f32 first-matmul result
                + tm_ * tn * 4)                   # f32 second-matmul result (pre-cast)

    if M < 8:
        tm = M                                    # block == full dim (allowed)
    else:
        tm = min(_round_up(M, 8), _round_up(block_m, 8))
        while tm > 8 and int(1.3 * vmem_need(tm)) > vmem_cap:
            tm = _round_up(tm // 2, 8)
        # v7x has 2 TensorCores: ensure the "parallel" M axis has >= 2 tiles.
        if pl.cdiv(M, tm) < 2 and M >= 16:
            tm = _round_up(pl.cdiv(M, 2), 8)
    grid_m = pl.cdiv(M, tm)

    vmem_limit = int(min(max(int(1.3 * vmem_need(tm)), 32 * 1024 * 1024),
                         max(vmem_cap, 32 * 1024 * 1024)))

    cost = pl.CostEstimate(
        flops=2 * M * rank_p * (in_features + out_features),
        transcendentals=0,
        bytes_accessed=(M * in_features * xb + M * out_features * ob
                        + rank_p * (in_features + out_features) * cb),
    )

    out2d = pl.pallas_call(
        _lora_kernel,
        out_shape=jax.ShapeDtypeStruct((M, out_features), out_dtype),
        grid_spec=pltpu.PrefetchScalarGridSpec(
            num_scalar_prefetch=0,
            grid=(grid_m, grid_n),
            in_specs=[
                pl.BlockSpec((tm, in_features), lambda i, n: (i, 0)),    # streamed x tiles
                pl.BlockSpec((rank_p, in_features), lambda i, n: (0, 0)),  # lora_A, resident
                pl.BlockSpec((rank_p, tn), lambda i, n: (0, n)),         # lora_B^T tile
            ],
            out_specs=pl.BlockSpec((tm, tn), lambda i, n: (i, n)),
            scratch_shapes=[pltpu.VMEM((tm, rank_p), compute_dtype)],    # low-rank intermediate
        ),
        compiler_params=pltpu.CompilerParams(
            dimension_semantics=("parallel", "arbitrary"),
            vmem_limit_bytes=vmem_limit,
        ),
        cost_estimate=cost,
    )(x2d, a, bt)

    return out2d.reshape(*lead, out_features)


def init_lora_params(key, in_features: int, out_features: int, rank: int):
    """Deterministic init matching LoRALayer.reset_parameters().

    lora_A: kaiming_uniform_(a=sqrt(5)) -> U(-bound, bound),
            bound = gain * sqrt(3 / fan_in), gain = sqrt(2 / (1 + a^2))
    lora_B: zeros
    """
    a = math.sqrt(5.0)
    gain = math.sqrt(2.0 / (1.0 + a * a))
    bound = gain * math.sqrt(3.0 / in_features)
    lora_A = jax.random.uniform(
        key, (rank, in_features), dtype=jnp.float32, minval=-bound, maxval=bound)
    lora_B = jnp.zeros((out_features, rank), dtype=jnp.float32)
    return lora_A, lora_B


def _emulated_ref(x, lora_A, lora_B, alpha, rank, compute_dtype=jnp.bfloat16, out_dtype=None):
    """Plain-JAX reference replicating the kernel's cast points exactly."""
    if out_dtype is None:
        out_dtype = jnp.result_type(x.dtype, lora_A.dtype, lora_B.dtype)
    scaling = float(alpha) / float(rank)
    in_f = lora_A.shape[1]
    out_f = lora_B.shape[0]
    lead = x.shape[:-1]
    xb = x.reshape(-1, in_f).astype(compute_dtype)
    a = (lora_A.astype(jnp.float32) * scaling).astype(compute_dtype)
    bt = lora_B.T.astype(compute_dtype)
    tmp = lax.dot_general(xb, a, (((1,), (1,)), ((), ())),
                          preferred_element_type=jnp.float32).astype(compute_dtype)
    out = jnp.dot(tmp, bt, preferred_element_type=jnp.float32)
    return out.astype(out_dtype).reshape(*lead, out_f)


if __name__ == "__main__":
    # Small shapes consistent with the module's forward: x: (batch, seq, in_features)
    batch, seq, in_features = 2, 8, 32
    out_features, rank, alpha = 32, 16, 32.0
    scaling = alpha / rank

    key = jax.random.PRNGKey(0)
    k_x, k_a, k_b, k_x2, k_a2, k_b2 = jax.random.split(key, 6)

    x = jax.random.normal(k_x, (batch, seq, in_features), dtype=jnp.float32)

    # 1) Module-faithful init: lora_B = 0 -> output must be exactly zero.
    lora_A, lora_B = init_lora_params(k_a, in_features, out_features, rank)
    out0 = jax.block_until_ready(lora_forward(x, lora_A, lora_B, alpha=alpha, rank=rank))
    assert out0.shape == (batch, seq, out_features) and out0.dtype == x.dtype
    assert bool(jnp.all(out0 == 0.0))

    # 2) Non-trivial lora_B to validate the matmul path numerically.
    lora_B_rand = 0.1 * jax.random.normal(k_b, (out_features, rank), dtype=jnp.float32)
    out = jax.block_until_ready(
        lora_forward(x, lora_A, lora_B_rand, alpha=alpha, rank=rank))

    ref_f32 = (x @ lora_A.T @ lora_B_rand.T) * scaling  # pure-f32 reference (loose: bf16 path)
    assert out.shape == ref_f32.shape
    assert bool(jnp.allclose(out, ref_f32, atol=5e-2, rtol=5e-2)), \
        float(jnp.max(jnp.abs(out - ref_f32)))

    ref_emul = _emulated_ref(x, lora_A, lora_B_rand, alpha, rank)  # same casts as kernel (tight)
    assert bool(jnp.allclose(out, ref_emul, atol=5e-3, rtol=5e-3)), \
        float(jnp.max(jnp.abs(out - ref_emul)))

    # 2b) bf16 output knob (halves HBM writeback when the consumer tolerates it).
    out_bf16 = jax.block_until_ready(
        lora_forward(x, lora_A, lora_B_rand, alpha=alpha, rank=rank, out_dtype=jnp.bfloat16))
    assert out_bf16.dtype == jnp.bfloat16
    assert bool(jnp.allclose(out_bf16.astype(jnp.float32), ref_emul, atol=2e-2, rtol=2e-2))

    # 3) Ragged M (not a tile multiple), out_features not a multiple of 128, rank < 16.
    b2, s2, in2, out2, rank2, alpha2 = 2, 37, 48, 80, 8, 32.0
    x2 = jax.random.normal(k_x2, (b2, s2, in2), dtype=jnp.float32)
    A2 = 0.1 * jax.random.normal(k_a2, (rank2, in2), dtype=jnp.float32)
    B2 = 0.1 * jax.random.normal(k_b2, (out2, rank2), dtype=jnp.float32)
    out_2 = jax.block_until_ready(lora_forward(x2, A2, B2, alpha=alpha2, rank=rank2))
    ref2 = _emulated_ref(x2, A2, B2, alpha2, rank2)
    assert out_2.shape == (b2, s2, out2)
    assert bool(jnp.allclose(out_2, ref2, atol=5e-3, rtol=5e-3)), \
        float(jnp.max(jnp.abs(out_2 - ref2)))

    # 4) disable_adaptation(): zeros of the output shape.
    out_dis = lora_forward(x, lora_A, lora_B_rand, alpha=alpha, rank=rank, enabled=False)
    assert out_dis.shape == (batch, seq, out_features)
    assert bool(jnp.all(out_dis == 0.0))

    print("KERNEL_OK")
</pallas_src>

<mosaic_0001>
module attributes {stable_mosaic.version = 11 : i64} {
  func.func @_lora_kernel(%arg0: i32, %arg1: i32, %arg2: memref<8x32xf32, #tpu.memory_space<vmem>>, %arg3: memref<16x32xbf16, #tpu.memory_space<vmem>>, %arg4: memref<16x32xbf16, #tpu.memory_space<vmem>>, %arg5: memref<8x32xf32, #tpu.memory_space<vmem>>, %arg6: memref<8x16xbf16, #tpu.memory_space<vmem>>) attributes {dimension_semantics = [#tpu.dimension_semantics<parallel>, #tpu.dimension_semantics<arbitrary>], iteration_bounds = array<i64: 2, 1>, scalar_prefetch = 0 : i64, scratch_operands = 1 : i64, tpu.core_type = #tpu.core_type<tc>, window_params = [{transform_indices = @transform_0, window_bounds = array<i64: 8, 32>}, {pipeline_mode = #tpu.pipeline_mode<synchronous>, transform_indices = @transform_1, window_bounds = array<i64: 16, 32>}, {transform_indices = @transform_2, window_bounds = array<i64: 16, 32>}, {transform_indices = @transform_3, window_bounds = array<i64: 8, 32>}]} {
    %c0_i32 = arith.constant 0 : i32
    %0 = arith.cmpi eq, %arg1, %c0_i32 : i32
    %1 = arith.extui %0 : i1 to i32
    %c0_i32_0 = arith.constant 0 : i32
    %2 = arith.cmpi ne, %1, %c0_i32_0 : i32
    scf.if %2 {
      %c0_6 = arith.constant 0 : index
      %c0_7 = arith.constant 0 : index
      %7 = vector.load %arg2[%c0_6, %c0_7] : memref<8x32xf32, #tpu.memory_space<vmem>>, vector<8x32xf32>
      %8 = arith.truncf %7 : vector<8x32xf32> to vector<8x32xbf16>
      %c0_8 = arith.constant 0 : index
      %c0_9 = arith.constant 0 : index
      %9 = vector.load %arg3[%c0_8, %c0_9] : memref<16x32xbf16, #tpu.memory_space<vmem>>, vector<16x32xbf16>
      %cst_10 = arith.constant dense<0.000000e+00> : vector<8x16xf32>
      %10 = tpu.matmul %8, %9, %cst_10 {dimension_numbers = #tpu.dot_dimension_numbers<[1], [1], [0], [0], [0, 0, 1, 0], [], []>} : vector<8x32xbf16>, vector<16x32xbf16>, vector<8x16xf32> -> vector<8x16xf32>
      %11 = arith.truncf %10 : vector<8x16xf32> to vector<8x16xbf16>
      %c0_11 = arith.constant 0 : index
      %c0_12 = arith.constant 0 : index
      %12 = vector.load %arg6[%c0_11, %c0_12] : memref<8x16xbf16, #tpu.memory_space<vmem>>, vector<8x16xbf16>
      tpu.vector_store %arg6[%c0_11, %c0_12], %11 {strides = array<i32>} : memref<8x16xbf16, #tpu.memory_space<vmem>>, vector<8x16xbf16>,
    } else {
    }
    %c0 = arith.constant 0 : index
    %c0_1 = arith.constant 0 : index
    %3 = vector.load %arg6[%c0, %c0_1] : memref<8x16xbf16, #tpu.memory_space<vmem>>, vector<8x16xbf16>
    %c0_2 = arith.constant 0 : index
    %c0_3 = arith.constant 0 : index
    %4 = vector.load %arg4[%c0_2, %c0_3] : memref<16x32xbf16, #tpu.memory_space<vmem>>, vector<16x32xbf16>
    %cst = arith.constant dense<0.000000e+00> : vector<8x32xf32>
    %5 = tpu.matmul %3, %4, %cst {dimension_numbers = #tpu.dot_dimension_numbers<[1], [0], [0], [1], [0, 0, 1, 1], [], []>} : vector<8x16xbf16>, vector<16x32xbf16>, vector<8x32xf32> -> vector<8x32xf32>
    %c0_4 = arith.constant 0 : index
    %c0_5 = arith.constant 0 : index
    %6 = vector.load %arg5[%c0_4, %c0_5] : memref<8x32xf32, #tpu.memory_space<vmem>>, vector<8x32xf32>
    tpu.vector_store %arg5[%c0_4, %c0_5], %5 {strides = array<i32>} : memref<8x32xf32, #tpu.memory_space<vmem>>, vector<8x32xf32>,
    return
  }
  func.func @transform_0(%arg0: i32, %arg1: i32) -> (i32, i32) {
    %c0_i32 = arith.constant 0 : i32
    %c0_i32_0 = arith.constant 0 : i32
    return %arg0, %c0_i32 : i32, i32
  }
  func.func @transform_1(%arg0: i32, %arg1: i32) -> (i32, i32) {
    %c0_i32 = arith.constant 0 : i32
    %c0_i32_0 = arith.constant 0 : i32
    %c0_i32_1 = arith.constant 0 : i32
    return %c0_i32, %c0_i32_0 : i32, i32
  }
  func.func @transform_2(%arg0: i32, %arg1: i32) -> (i32, i32) {
    %c0_i32 = arith.constant 0 : i32
    %c0_i32_0 = arith.constant 0 : i32
    return %c0_i32, %arg1 : i32, i32
  }
  func.func @transform_3(%arg0: i32, %arg1: i32) -> (i32, i32) {
    %c0_i32 = arith.constant 0 : i32
    return %arg0, %arg1 : i32, i32
  }
}

</mosaic_0001>

<bundles_post_ra>
// kernel: tpu_custom_call.1
= control target key start
LH: loop header
LB: loop body
LE: loop exit
PB: predicated region body
PF: predicated region fallthrough
CT: control target
= control target key end

     0   :  { %8 = vsyncpa [#allocation4], 0  ;;  %s1055_s0 = inlined_call_operand.hbm [shape: f32[16,32], index: 0, kind: input, shape index: {}]   ;;  %s1056_s1 = inlined_call_operand.hbm [shape: bf16[16,32], index: 1, kind: input, shape index: {}]   ;;  %s1057_s2 = inlined_call_operand.hbm [shape: bf16[16,32], index: 2, kind: input, shape index: {}]   ;;  %s1058_s3 = inlined_call_operand.hbm [shape: f32[16,32], index: 3, kind: output, shape index: {}]  }
   0x1   :  { %10 = vsyncpa [#allocation4 + $0x1], 0 }
   0x2   :  { %11 = vsyncpa [#allocation7], 0 }
   0x3   :  { %12 = vsyncpa [#allocation5], 0 }
   0x4   :  { %14 = vsyncpa [#allocation5 + $0x1], 0  ;;  %s798_s12 = smov 0   ;;  %s800_s13 = smov 0  }
   0x5   :  { %s802_s14 = smov 0   ;;  %s804_s15 = smov 0  }
   0x6   :  { %s806_s16 = smov 0   ;;  %s808_s17 = smov 0  }
   0x7 LB: > { %s470_s18 = sadd.s32 4294967295, %s768_s17   ;;  %s471_s19 = sadd.s32 4294967294, %s768_s17   ;;  %s768_s17 = sphi %s808_s17, %s20_s17   ;;  %s764_s16 = sphi %s806_s16, %s1080_s16   ;;  %s760_s15 = sphi %s804_s15, %s1079_s15   ;;  %s756_s14 = sphi %s802_s14, %s1078_s14   ;;  %s752_s13 = sphi %s800_s13, %s1077_s13   ;;  %s748_s12 = sphi %s798_s12, %s1076_s12  }
   0x8   : > { %p52_p0 = scmp.ne.s32.totalorder %s752_s13, %s748_s12  ;;  %p832_p1 = scmp.eq.s32.totalorder %s470_s18, 0 }
   0x9   : > { %p836_p2 = scmp.eq.s32.totalorder %s470_s18, 1  ;;  %p131_p3 = scmp.eq.s32.totalorder %s471_s19, 1 }
   0xa   : > { %s1063_s20 = scalar_select %p832_p1, 1, 0 }
   0xb   : > { %p842_p4 = por %p832_p1, %p52_p0  ;;  %p472_p5 = scmp.ge.s32.totalorder %s768_s17, 1 }
   0xc   : > { %p847_p6 = por %p131_p3, %p52_p0  ;;  %p138_p7 = scmp.lt.s32.totalorder %s768_s17, 3 }
   0xd   : > { %s1065_s22 = scalar_select %p842_p4, 1, 0 }
   0xe   : > { %s1066_s23 = scalar_select %p847_p6, 1, 0 }
   0xf   : > { %p852_p8 = pnand %p472_p5, %p138_p7  ;;  %s770_s25 = smov [#allocation6]  }
  0x10   : > { %s150_s26 = sshll.u32 %s770_s25, 4  ;;  %s771_s28 = smov [#allocation8]   ;;  %s856_s26 = int_to_ptr.vmem [resolvable:$true] %s150_s26 }
  0x11   : > { %p519_p9 = pneg %p852_p8  ;;  %s165_s29 = sshll.u32 %s771_s28, 4  ;;  %s867_s29 = int_to_ptr.vmem [resolvable:$true] %s165_s29 }
  0x12   : > { %s596_s5 = scalar_lea.hbm %s1056_s1, 128 }
  0x13   : > { %p863_p11 = pnand %p519_p9, %p832_p1  ;;  %p597_p12 = scmp.ne.s32.totalorder %s1056_s1, %s596_s5 }
  0x14   : > { %p603_p5 = scmp.lt.u32.totalorder %s596_s5, %s1056_s1 }
  0x15   : > { %p598_p13 = pneg %p863_p11 }
  0x17   : > { %p599_p0 = pnand %p598_p13, %p597_p12 }
  0x19   : > { %p600_p3 = pneg %p599_p0 }
  0x1b   : > { %p605_p7 = pnand %p603_p5, %p600_p3 }
  0x1d   : > { %608 = shalt.err (!%p605_p7)
}
  0x1e   : > { %s609_s10 = scalar_lea.vmem %s856_s26, 128  ;;  %p617_p1 = scmp.lt.s32.totalorder %s856_s26, %s856_s26 }
  0x1f   : > { %p610_p9 = scmp.ne.s32.totalorder %s856_s26, %s609_s10  ;;  %p618_p12 = scmp.lt.s32.totalorder %s609_s10, %s609_s10 }
  0x21   : > { %p612_p10 = pnand %p610_p9, %p598_p13  ;;  %p619_p0 = por %p618_p12, %p617_p1 }
  0x23   : > { %p613_p6 = pneg %p612_p10 }
  0x25   : > { %p620_p4 = pnand %p619_p0, %p613_p6 }
  0x27   : > { %623 = shalt.err (!%p620_p4)
}
  0x28   : > { %s772_s11 = smov 64   ;;  %s773_s18 = smov 4  }
  0x29   : > { %522 = dma.hbm_to_vmem [thread:$0]  (!%p863_p11), %s1056_s1, 128, %s856_s26, [#allocation7], %s772_s11, %s772_s11, %s773_s18  }
  0x2a   : > { %s624_s4 = scalar_lea.hbm %s1057_s2, 128 }
  0x2b   : > { %p625_p1 = scmp.ne.s32.totalorder %s1057_s2, %s624_s4  ;;  %p631_p10 = scmp.lt.u32.totalorder %s624_s4, %s1057_s2 }
  0x2d   : > { %p627_p4 = pnand %p625_p1, %p598_p13 }
  0x2f   : > { %p628_p6 = pneg %p627_p4 }
  0x31   : > { %p633_p3 = pnand %p631_p10, %p628_p6 }
  0x33   : > { %636 = shalt.err (!%p633_p3)
}
  0x34   : > { %s637_s26 = scalar_lea.vmem %s867_s29, 128  ;;  %p645_p12 = scmp.lt.s32.totalorder %s867_s29, %s867_s29 }
  0x35   : > { %p638_p5 = scmp.ne.s32.totalorder %s867_s29, %s637_s26  ;;  %p646_p0 = scmp.lt.s32.totalorder %s637_s26, %s637_s26 }
  0x37   : > { %p640_p7 = pnand %p638_p5, %p598_p13  ;;  %p647_p1 = por %p646_p0, %p645_p12 }
  0x39   : > { %p641_p9 = pneg %p640_p7 }
  0x3b   : > { %p648_p4 = pnand %p647_p1, %p641_p9 }
  0x3d   : > { %651 = shalt.err (!%p648_p4)
}
  0x3e   : > { %525 = dma.hbm_to_vmem [thread:$0]  (!%p863_p11), %s1057_s2, 128, %s867_s29, [#allocation7], %s772_s11, %s772_s11, %s773_s18  }
  0x3f   : > { %s32_s19 = sadd.s32 1, %s764_s16  ;;  %s39_s25 = sadd.s32 1, %s756_s14 }
  0x40   : > { %p34_p13 = scmp.ge.s32.totalorder %s32_s19, 2  ;;  %p46_p6 = scmp.ne.s32.totalorder %s756_s14, %s752_s13 }
  0x41   : > { %p47_p10 = scmp.eq.s32.totalorder %s768_s17, 0  ;;  %p536_p3 = scmp.lt.s32.totalorder %s768_s17, 2 }
  0x42   : > { %s1082_s19 = smov (%p34_p13, %s32_s19), 0  ;;  %p931_p7 = por %p836_p2, %p46_p6 }
  0x43   : > { %p48_p5 = por %p47_p10, %p46_p6  ;;  %s36_s28 = ssub.s32 %s764_s16, %s1082_s19 }
  0x44   : > { %s1069_s27 = scalar_select %p931_p7, 1, 0 }
  0x45   : > { %s179_s30 = sand.u32 1, %s756_s14   ;;  %p37_p9 = scmp.eq.s32.totalorder %s36_s28, 0 }
  0x46   : > { %s476_s29 = sshll.u32 %s179_s30, 3  ;;  %s477_s11 = sshll.u32 %s764_s16, 7 }
  0x47   : > { %s940_s18 = scalar_select %p37_p9, %s756_s14, %s39_s25  }
  0x48   : > { %s945_s6 = scalar_lea.hbm %s1055_s0, %s477_s11  ;;  %s183_s21 = scalar_lea.vmem [#allocation3], %s476_s29 }
  0x49   : > { %s190_s7 = sshll.u32 %s183_s21, 4  ;;  %p949_p2 = pnand %p536_p3, %p48_p5  ;;  %s953_s7 = int_to_ptr.vmem [resolvable:$true] %s190_s7 }
  0x4a   : > { %s180_s26 = scalar_lea.sflag [#allocation4], %s179_s30  ;;  %s652_s9 = scalar_lea.hbm %s945_s6, 128 }
  0x4b   : > { %p653_p11 = scmp.ne.s32.totalorder %s945_s6, %s652_s9  ;;  %p654_p12 = pneg %p949_p2 }
  0x4c   : > { %s657_s28 = scalar_lea.hbm %s1055_s0, 256  ;;  %p658_p4 = scmp.lt.u32.totalorder %s945_s6, %s1055_s0 }
  0x4d   : > { %p655_p0 = pnand %p654_p12, %p653_p11  ;;  %p659_p13 = scmp.lt.u32.totalorder %s657_s28, %s652_s9 }
  0x4e   : > { %p661_p10 = scmp.lt.u32.totalorder %s652_s9, %s945_s6 }
  0x4f   : > { %p656_p1 = pneg %p655_p0  ;;  %p660_p6 = por %p659_p13, %p658_p4 }
  0x51   : > { %p662_p3 = por %p661_p10, %p660_p6 }
  0x53   : > { %p663_p5 = pnand %p662_p3, %p656_p1 }
  0x55   : > { %666 = shalt.err (!%p663_p5)
}
  0x56   : > { %s667_s30 = scalar_lea.vmem %s953_s7, 128  ;;  %s774_s4 = smov [#allocation3]  }
  0x57   : > { %p668_p9 = scmp.ne.s32.totalorder %s953_s7, %s667_s30  ;;  %s672_s5 = sshll.u32 %s774_s4, 4  ;;  %s673_s5 = int_to_ptr.vmem [resolvable:$false] %s672_s5 }
  0x58   : > { %s674_s21 = scalar_lea.vmem %s673_s5, 256  ;;  %p675_p7 = scmp.lt.s32.totalorder %s953_s7, %s673_s5 }
  0x59   : > { %p670_p11 = pnand %p668_p9, %p654_p12  ;;  %p676_p4 = scmp.lt.s32.totalorder %s674_s21, %s667_s30 }
  0x5b   : > { %p671_p0 = pneg %p670_p11  ;;  %p677_p13 = por %p676_p4, %p675_p7 }
  0x5d   : > { %p678_p6 = pnand %p677_p13, %p671_p0 }
  0x5f   : > { %681 = shalt.err (!%p678_p6)
}
  0x60   : > { %529 = dma.hbm_to_vmem [thread:$0]  (!%p949_p2), %s945_s6, 128, %s953_s7, %s180_s26  }
  0x61   : > { %199 = sbr.rel (%p852_p8) target bundleno = 567 (0x237), region = 32  ;;  %s983_s9 = sand.u32 (!%p852_p8), 1, %s752_s13  }
  0x62   : > { %s479_s10 = sshll.u32 (!%p852_p8), %s983_s9, 3  ;;  %s202_s25 = scalar_lea.sflag (!%p852_p8), [#allocation4], %s983_s9 }
  0x63   : > { %s205_s28 = scalar_lea.vmem (!%p852_p8), [#allocation3], %s479_s10  ;;  %p1071_p7 = scmp.ne.s32.totalorder (!%p852_p8), %s1065_s22, 0 }
  0x68   : > { %735 = dma.done.wait (%p1071_p7), %s202_s25, 128  }
  0x69   : > { %737 = vsyncadd (%p1071_p7), %s202_s25, 4294967168  ;;  %p1072_p2 = scmp.ne.s32.totalorder %s1063_s20, 0 }
  0x6b   : > { %739 = dma.done.wait (%p1072_p2), [#allocation7], 256  }
  0x6c   : > { %741 = vsyncadd (%p1072_p2), [#allocation7], 4294967040  ;;  %v775_v0 = vmov 0.0   ;;  %vm776_vm0 = vmmov 0   ;;  %vm250_vm1 = vcmask 261120   ;;  %v594_v1 = vld [vmem:[#allocation6] sm:$0xff]  }
  0x6d   : > { %495 = vmatprep.subr.bf16.mxu0 %v775_v0  ;;  %497 = vmatprep.mubr.msk.bf16.mxu0 %vm776_vm0, %v775_v0  ;;  %v255_v2 = vsel %vm250_vm1, %v594_v1, 0  ;;  %v241_v3 = vld [vmem:[%s205_s28] sm:$0xff]  ;;  %v595_v5 = vld [vmem:[#allocation8] sm:$0xff]   ;;  %vm298_vm2 = vcmask 125952   ;;  %vm309_vm3 = vcmask 130048   ;;  %s488_s20 = sshll.u32 %s760_s15, 7 }
  0x6e   : > { %501 = vmatprep.subr.bf16.mxu1 %v775_v0  ;;  %503 = vmatprep.mubr.msk.bf16.mxu1 %vm776_vm0, %v775_v0  ;;  %v242_v4 = vpack.c.bf16 %v241_v3, %v241_v3  ;;  %s235_s22 = scalar_lea.vmem [#allocation9], %s479_s10  ;;  %s1005_s8 = scalar_lea.hbm %s1058_s3, %s488_s20 }
  0x6f   : > { %496 = vmatpush3.bf16.xpose.msra.mxu0 %v255_v2  ;;  %502 = vmatpush3.bf16.msra.mxu1 %v595_v5  ;;  %s370_s24 = sshll.u32 %s235_s22, 4  ;;  %s356_s26 = scalar_lea.sflag [#allocation5], %s983_s9  ;;  %s1007_s24 = int_to_ptr.vmem [resolvable:$true] %s370_s24 }
  0x70   : > { %s682_s15 = scalar_lea.vmem %s1007_s24, 128  ;;  %p1073_p12 = scmp.ne.s32.totalorder %s1069_s27, 0 }
  0x71   : > { %p683_p8 = scmp.ne.s32.totalorder %s1007_s24, %s682_s15  ;;  %s777_s29 = smov [#allocation9]  }
  0x72   : > { %s686_s11 = sshll.u32 %s777_s29, 4  ;;  %s687_s11 = int_to_ptr.vmem [resolvable:$false] %s686_s11 }
  0x73   : > { %p684_p1 = pnand %p683_p8, %p1073_p12  ;;  %s688_s30 = scalar_lea.vmem %s687_s11, 256 }
  0x74   : > { %p689_p3 = scmp.lt.s32.totalorder %s1007_s24, %s687_s11  ;;  %p690_p5 = scmp.lt.s32.totalorder %s688_s30, %s682_s15 }
  0x75   : > { %p685_p10 = pneg %p684_p1 }
  0x76   : > { %498 = vmatmul.mubr.msk.bf16.vlgmr.msra.gmra.mrb[0].mxu0 %vm250_vm1, %v242_v4  ;;  %p691_p9 = por %p690_p5, %p689_p3 }
  0x78   : > { %p692_p11 = pnand %p691_p9, %p685_p10 }
 0x149   : > { %v291_v6 = vpop.f32.mrb[0].mxu0 }
 0x14a   : > { %v297_v7 = vpack.c.bf16 %v291_v6, %v291_v6  ;;  %v499_v8 = vpop.f32.mrb[1].mxu0 }
 0x14b   : > { %v294_v9 = vpop.f32.mrb[2].mxu0 }
 0x14c   : > { %299 = vst.msk [vmem:[#allocation2] sm:$0xf] %vm298_vm2, %v297_v7  ;;  %v500_v10 = vpop.f32.mrb[3].mxu0 }
 0x153   : > { %v300_v11 = vld [vmem:[#allocation2] sm:$0xf] }
 0x154   : > { %504 = vmatmul.mubr.msk.bf16.vlgmr.msra.gmra.mrb[0].mxu1 %vm309_vm3, %v300_v11 }
 0x227   : > { %v347_v12 = vpop.f32.mrb[0].mxu1 }
 0x228   : > { %354 = vst.msk [vmem:[%s235_s22] sm:$0xff] %vm250_vm1, %v347_v12  ;;  %v505_v13 = vpop.f32.mrb[1].mxu1 }
 0x229   : > { %v350_v14 = vpop.f32.mrb[2].mxu1 }
 0x22a   : > { %695 = shalt.err (!%p692_p11)
}
 0x22b   : > { %s696_s4 = scalar_lea.hbm %s1005_s8, 128  ;;  %s700_s9 = scalar_lea.hbm %s1058_s3, 256 }
 0x22c   : > { %p697_p0 = scmp.ne.s32.totalorder %s1005_s8, %s696_s4  ;;  %p701_p6 = scmp.lt.u32.totalorder %s1005_s8, %s1058_s3 }
 0x22d   : > { %p702_p7 = scmp.lt.u32.totalorder %s700_s9, %s696_s4  ;;  %p704_p8 = scmp.lt.u32.totalorder %s696_s4, %s1005_s8 }
 0x22e   : > { %p698_p4 = pnand %p697_p0, %p1073_p12 }
 0x22f   : > { %p703_p2 = por %p702_p7, %p701_p6 }
 0x230   : > { %p699_p13 = pneg %p698_p4 }
 0x231   : > { %p705_p1 = por %p704_p8, %p703_p2 }
 0x233   : > { %p706_p10 = pnand %p705_p1, %p699_p13 }
 0x235   : > { %709 = shalt.err (!%p706_p10)
}
 0x236   : > { %517 = dma.vmem_to_hbm [thread:$0]  (%p1073_p12), %s1007_s24, 128, %s1005_s8, %s356_s26   ;;  %v506_v15 = vpop.f32.mrb[3].mxu1 }
 0x237 PF: > { %s382_s28 = sand.u32 1, %s748_s12   ;;  %p1074_p3 = scmp.ne.s32.totalorder %s1066_s23, 0 }
 0x238   : > { %p1075_p5 = scmp.ge.s32.totalorder %s768_s17, 2  ;;  %s383_s20 = scalar_lea.sflag [#allocation5], %s382_s28 }
 0x23a   : > { %p531_p9 = pnand %p1075_p5, %p1074_p3 }
 0x23c   : > { %743 = dma.done.wait (!%p531_p9), %s383_s20, 128  }
 0x23d   : > { %745 = vsyncadd (!%p531_p9), %s383_s20, 4294967168  ;;  %s20_s17 = sadd.s32 1, %s768_s17   ;;  %s1076_s12 = smov %s752_s13 }
 0x23e   : > { %p17_p11 = scmp.ge.s32.totalorder %s20_s17, 4   ;;  %s1077_s13 = smov %s756_s14 }
 0x23f   : > { %s1078_s14 = smov %s940_s18  ;;  %s1079_s15 = smov %s764_s16 }
 0x240   : > { %s1080_s16 = smov %s1082_s19  ;;  %19 = sbr.rel (!%p17_p11) target bundleno = 7 (0x7), region = 90 }
 0x247   :  { %388 = vsyncpa [#allocation4], 1 }
 0x248   :  { %390 = vsyncpa [#allocation4 + $0x1], 1 }
 0x249   :  { %391 = vsyncpa [#allocation7], 1 }
 0x24a   :  { %392 = vsyncpa [#allocation5], 1 }
 0x24b   :  { %394 = vsyncpa [#allocation5 + $0x1], 1 }

</bundles_post_ra>
